<compile_context>
chip_gen: v7x
topology: tpu7x:2x2x1
jax: 0.10.0
libtpu: 0.0.40
codegen_flags: <defaults>
</compile_context>

<pallas_src>
import functools

import jax
import jax.numpy as jnp
from jax.experimental import pallas as pl
from jax.experimental.pallas import tpu as pltpu

_LANE = 128
_RESIDENT_BYTES = 4 * 1024 * 1024  # budget to keep the (n, d) rhs fully VMEM-resident


def _round_up(x, m):
    return ((x + m - 1) // m) * m


def _pick_tile(extent, candidates):
    for c in candidates:
        if c <= extent and extent % c == 0:
            return c
    return extent


# ----------------------------- kernels --------------------------------------


def _fused_gin_kernel(adj_ref, x_ref, w0_ref, b0_ref, w1_ref, b1_ref, o_ref):
    """Whole 2-layer GIN forward with everything VMEM-resident (small padded N)."""
    # layer 0: h = (adj_aug @ x) @ W0 + b0 ; x1 = relu(h)
    agg0 = jnp.dot(adj_ref[...], x_ref[...], preferred_element_type=jnp.float32)
    h = jnp.dot(agg0.astype(jnp.bfloat16), w0_ref[...],
                preferred_element_type=jnp.float32) + b0_ref[...]
    x1 = jnp.maximum(h, 0.0).astype(jnp.bfloat16)
    # layer 1: logits = (adj_aug @ x1) @ W1 + b1
    agg1 = jnp.dot(adj_ref[...], x1, preferred_element_type=jnp.float32)
    logits = jnp.dot(agg1.astype(jnp.bfloat16), w1_ref[...],
                     preferred_element_type=jnp.float32) + b1_ref[...]
    o_ref[...] = logits.astype(o_ref.dtype)


def _project_kernel(x_ref, w_ref, o_ref):
    # Row-tiled dense projection: o = x @ W (bf16 operands, f32 accumulate, bf16 out).
    o_ref[...] = jnp.dot(
        x_ref[...], w_ref[...], preferred_element_type=jnp.float32
    ).astype(o_ref.dtype)


def _agg_only_kernel(a_ref, xw_ref, b_ref, o_ref, acc_ref, *,
                     apply_relu, rhs_resident, tk):
    # project_first path:  acc[tm, Dout] += adj_aug[tm, tk] @ xw[tk, Dout]
    # finalize:            out = acc + b (+ optional ReLU)
    k = pl.program_id(1)

    @pl.when(k == 0)
    def _():
        acc_ref[...] = jnp.zeros_like(acc_ref)

    if rhs_resident:
        xw = xw_ref[pl.ds(pl.multiple_of(k * tk, tk), tk), :]
    else:
        xw = xw_ref[...]
    acc_ref[...] += jnp.dot(a_ref[...], xw, preferred_element_type=jnp.float32)

    @pl.when(k == pl.num_programs(1) - 1)
    def _():
        out = acc_ref[...] + b_ref[...]
        if apply_relu:
            out = jnp.maximum(out, 0.0)
        o_ref[...] = out.astype(o_ref.dtype)


def _agg_project_kernel(a_ref, x_ref, w_ref, b_ref, o_ref, acc_ref, *,
                        apply_relu, rhs_resident, tk):
    # aggregate-then-project path (Din <= Dout):
    #   acc[tm, Din] += adj_aug[tm, tk] @ x[tk, Din]
    # finalize: out = acc @ W + b (+ optional ReLU)
    k = pl.program_id(1)

    @pl.when(k == 0)
    def _():
        acc_ref[...] = jnp.zeros_like(acc_ref)

    if rhs_resident:
        x = x_ref[pl.ds(pl.multiple_of(k * tk, tk), tk), :]
    else:
        x = x_ref[...]
    acc_ref[...] += jnp.dot(a_ref[...], x, preferred_element_type=jnp.float32)

    @pl.when(k == pl.num_programs(1) - 1)
    def _():
        out = jnp.dot(acc_ref[...].astype(jnp.bfloat16), w_ref[...],
                      preferred_element_type=jnp.float32) + b_ref[...]
        if apply_relu:
            out = jnp.maximum(out, 0.0)
        o_ref[...] = out.astype(o_ref.dtype)


# ----------------------------- wrappers --------------------------------------


def _fused_forward(adj_bf16, x0_bf16, w0, b0, w1, b1):
    n = adj_bf16.shape[0]
    d2 = w1.shape[1]
    return pl.pallas_call(
        _fused_gin_kernel,
        out_shape=jax.ShapeDtypeStruct((n, d2), jnp.float32),
    )(adj_bf16, x0_bf16, w0, b0, w1, b1)


def _project(x_bf16, w_bf16):
    """Row-tiled xw = x @ W (bf16 in/out). Shapes already lane-padded."""
    n, din = x_bf16.shape
    dout = w_bf16.shape[1]
    tm = _pick_tile(n, (1024, 512, 256, 128))
    return pl.pallas_call(
        _project_kernel,
        out_shape=jax.ShapeDtypeStruct((n, dout), jnp.bfloat16),
        grid_spec=pltpu.PrefetchScalarGridSpec(
            num_scalar_prefetch=0,
            grid=(n // tm,),
            in_specs=[
                pl.BlockSpec((tm, din), lambda i: (i, 0)),
                pl.BlockSpec((din, dout), lambda i: (0, 0)),
            ],
            out_specs=pl.BlockSpec((tm, dout), lambda i: (i, 0)),
        ),
        compiler_params=pltpu.CompilerParams(dimension_semantics=("parallel",)),
    )(x_bf16, w_bf16)


def gin_conv_layer(adj_aug_bf16, x, w_bf16, b2d, *, apply_relu, project_first,
                   out_dtype):
    """One GINConv('sum') layer. (1+eps)*I already folded into adj_aug_bf16.

    All shapes are assumed padded: N multiple of 128, feature dims multiples of 128.
    """
    n = adj_aug_bf16.shape[0]
    din, dout = w_bf16.shape
    tm = _pick_tile(n, (1024, 512, 256, 128))
    tk = _pick_tile(n, (512, 256, 128))
    grid = (n // tm, n // tk)

    x_bf16 = x.astype(jnp.bfloat16)

    if project_first:
        # xw = x @ W first so the N^2 contraction runs over the smaller Dout.
        rhs = _project(x_bf16, w_bf16)  # (n, dout) bf16
        d_rhs = dout
    else:
        rhs = x_bf16                    # (n, din) bf16
        d_rhs = din

    # Keep the (n, d) rhs fully VMEM-resident (constant block index -> DMA'd once),
    # eliminating the n/tm-fold re-read, whenever it fits a small budget.
    rhs_resident = (n * d_rhs * 2) <= _RESIDENT_BYTES
    if rhs_resident:
        rhs_spec = pl.BlockSpec((n, d_rhs), lambda i, k: (0, 0))
    else:
        rhs_spec = pl.BlockSpec((tk, d_rhs), lambda i, k: (k, 0))

    if project_first:
        kernel = functools.partial(_agg_only_kernel, apply_relu=apply_relu,
                                   rhs_resident=rhs_resident, tk=tk)
        in_specs = [
            pl.BlockSpec((tm, tk), lambda i, k: (i, k)),
            rhs_spec,
            pl.BlockSpec((1, dout), lambda i, k: (0, 0)),
        ]
        operands = (adj_aug_bf16, rhs, b2d)
        scratch = [pltpu.VMEM((tm, dout), jnp.float32)]
    else:
        kernel = functools.partial(_agg_project_kernel, apply_relu=apply_relu,
                                   rhs_resident=rhs_resident, tk=tk)
        in_specs = [
            pl.BlockSpec((tm, tk), lambda i, k: (i, k)),
            rhs_spec,
            pl.BlockSpec((din, dout), lambda i, k: (0, 0)),
            pl.BlockSpec((1, dout), lambda i, k: (0, 0)),
        ]
        operands = (adj_aug_bf16, rhs, w_bf16, b2d)
        scratch = [pltpu.VMEM((tm, din), jnp.float32)]

    return pl.pallas_call(
        kernel,
        out_shape=jax.ShapeDtypeStruct((n, dout), out_dtype),
        grid_spec=pltpu.PrefetchScalarGridSpec(
            num_scalar_prefetch=0,
            grid=grid,
            in_specs=in_specs,
            out_specs=pl.BlockSpec((tm, dout), lambda i, k: (i, 0)),
            scratch_shapes=scratch,
        ),
        compiler_params=pltpu.CompilerParams(
            dimension_semantics=("parallel", "arbitrary")
        ),
    )(*operands)


def gin_forward(adj, features, params, *, eps=0.0, fuse_threshold=1024):
    """Reproduces GIN.forward: (logits, e_list)."""
    (w0, b0), (w1, b1) = params
    n, d_data = features.shape
    d_hid = w0.shape[1]
    n_cls = w1.shape[1]

    # Lane-dense padding (N and feature dims to 128 lanes).
    np_ = _round_up(n, _LANE)
    d0p = _round_up(d_data, _LANE)
    d1p = _round_up(d_hid, _LANE)
    d2p = _round_up(n_cls, _LANE)

    # Fold (1+eps)*I into the adjacency, all in bf16 (no f32 N^2 temp in HBM).
    # NOTE: exact for eps == 0 (torch GINConv default); nonzero eps rounds to bf16.
    adj_aug = adj.astype(jnp.bfloat16) + (
        jnp.asarray(1.0 + eps, jnp.bfloat16) * jnp.eye(n, dtype=jnp.bfloat16)
    )
    adj_bf16 = jnp.pad(adj_aug, ((0, np_ - n), (0, np_ - n)))

    x0 = jnp.pad(features, ((0, np_ - n), (0, d0p - d_data))).astype(jnp.bfloat16)
    w0p = jnp.pad(w0, ((0, d0p - d_data), (0, d1p - d_hid))).astype(jnp.bfloat16)
    b0p = jnp.pad(b0, (0, d1p - d_hid)).astype(jnp.float32).reshape(1, d1p)
    w1p = jnp.pad(w1, ((0, d1p - d_hid), (0, d2p - n_cls))).astype(jnp.bfloat16)
    b1p = jnp.pad(b1, (0, d2p - n_cls)).astype(jnp.float32).reshape(1, d2p)

    if np_ <= fuse_threshold:
        # Small graph: adj + x + both weight matrices fit VMEM -> one kernel launch,
        # no HBM round-trips for the hidden activation.
        logits_p = _fused_forward(adj_bf16, x0, w0p, b0p, w1p, b1p)
    else:
        # Layer 0: GINConv -> h ; x1 = relu(h)  (ReLU fused, bf16 intermediate).
        x1 = gin_conv_layer(adj_bf16, x0, w0p, b0p, apply_relu=True,
                            project_first=(d1p < d0p), out_dtype=jnp.bfloat16)
        # Layer 1: GINConv -> logits.
        logits_p = gin_conv_layer(adj_bf16, x1, w1p, b1p, apply_relu=False,
                                  project_first=(d2p < d1p), out_dtype=jnp.float32)

    logits = logits_p[:n, :n_cls]
    e_list = []  # TODO(synk): per-edge values (GINConv's `e`) have no dense equivalent here.
    return logits, e_list


def _torch_linear_init(key, din, dout):
    """Deterministic init matching torch.nn.Linear default (uniform +-1/sqrt(fan_in))."""
    kw, kb = jax.random.split(key)
    bound = 1.0 / jnp.sqrt(jnp.float32(din))
    w = jax.random.uniform(kw, (din, dout), jnp.float32, -bound, bound)
    b = jax.random.uniform(kb, (dout,), jnp.float32, -bound, bound)
    return w, b


def _reference(adj, features, params):
    (w0, b0), (w1, b1) = params
    h = (features + adj @ features) @ w0 + b0
    x = jnp.maximum(h, 0.0)
    return (x + adj @ x) @ w1 + b1


if __name__ == "__main__":
    # Small shapes: dims = [d_data] + h_dims + [n_cls]
    N = 128        # number of nodes
    D_DATA = 32    # input feature dim
    H_DIM = 64     # hidden dim (single hidden layer => 2 GINConv layers)
    N_CLS = 8      # number of classes

    key = jax.random.PRNGKey(0)
    k_adj, k_feat, k_l0, k_l1 = jax.random.split(key, 4)

    # Random sparse-ish binary adjacency (dense representation).
    adj = (jax.random.uniform(k_adj, (N, N)) < 0.05).astype(jnp.float32)
    features = jax.random.normal(k_feat, (N, D_DATA), jnp.float32)

    params = (
        _torch_linear_init(k_l0, D_DATA, H_DIM),
        _torch_linear_init(k_l1, H_DIM, N_CLS),
    )
    logits_ref = _reference(adj, features, params)

    # bf16 matmul operands (f32 accumulation) -> relaxed tolerance vs f32 reference.
    ATOL, RTOL = 1.5e-1, 5e-2

    # 1) Fused small-N single-kernel path (default for padded N <= 1024).
    logits, e_list = gin_forward(adj, features, params)
    logits = jax.block_until_ready(logits)
    assert logits.shape == (N, N_CLS)
    assert jnp.allclose(logits, logits_ref, atol=ATOL, rtol=RTOL), (
        float(jnp.max(jnp.abs(logits - logits_ref)))
    )

    # 2) General tiled path (forced), exercising the aggregate-then-project kernels.
    logits_t, _ = gin_forward(adj, features, params, fuse_threshold=0)
    logits_t = jax.block_until_ready(logits_t)
    assert jnp.allclose(logits_t, logits_ref, atol=ATOL, rtol=RTOL), (
        float(jnp.max(jnp.abs(logits_t - logits_ref)))
    )

    # 3) Tiled path with Din > Dout, exercising the project-first (_project +
    #    _agg_only) kernels.
    D_BIG = 256
    k_feat2, k_l0b = jax.random.split(k_feat)
    features_b = jax.random.normal(k_feat2, (N, D_BIG), jnp.float32)
    params_b = (
        _torch_linear_init(k_l0b, D_BIG, H_DIM),
        params[1],
    )
    logits_b_ref = _reference(adj, features_b, params_b)
    logits_b, _ = gin_forward(adj, features_b, params_b, fuse_threshold=0)
    logits_b = jax.block_until_ready(logits_b)
    assert jnp.allclose(logits_b, logits_b_ref, atol=ATOL, rtol=RTOL), (
        float(jnp.max(jnp.abs(logits_b - logits_b_ref)))
    )

    print("KERNEL_OK")
</pallas_src>

<mosaic_0001>
module attributes {stable_mosaic.version = 11 : i64} {
  func.func @_fused_gin_kernel(%arg0: memref<128x128xbf16, #tpu.memory_space<vmem>>, %arg1: memref<128x128xbf16, #tpu.memory_space<vmem>>, %arg2: memref<128x128xbf16, #tpu.memory_space<vmem>>, %arg3: memref<1x128xf32, #tpu.memory_space<vmem>>, %arg4: memref<128x128xbf16, #tpu.memory_space<vmem>>, %arg5: memref<1x128xf32, #tpu.memory_space<vmem>>, %arg6: memref<128x128xf32, #tpu.memory_space<vmem>>) attributes {dimension_semantics = [], scalar_prefetch = 0 : i64, scratch_operands = 0 : i64, tpu.core_type = #tpu.core_type<tc>} {
    %c0 = arith.constant 0 : index
    %c0_0 = arith.constant 0 : index
    %0 = vector.load %arg0[%c0, %c0_0] : memref<128x128xbf16, #tpu.memory_space<vmem>>, vector<128x128xbf16>
    %c0_1 = arith.constant 0 : index
    %c0_2 = arith.constant 0 : index
    %1 = vector.load %arg1[%c0_1, %c0_2] : memref<128x128xbf16, #tpu.memory_space<vmem>>, vector<128x128xbf16>
    %cst = arith.constant dense<0.000000e+00> : vector<128x128xf32>
    %2 = tpu.matmul %0, %1, %cst {dimension_numbers = #tpu.dot_dimension_numbers<[1], [0], [0], [1], [0, 0, 1, 1], [], []>} : vector<128x128xbf16>, vector<128x128xbf16>, vector<128x128xf32> -> vector<128x128xf32>
    %3 = arith.truncf %2 : vector<128x128xf32> to vector<128x128xbf16>
    %c0_3 = arith.constant 0 : index
    %c0_4 = arith.constant 0 : index
    %4 = vector.load %arg2[%c0_3, %c0_4] : memref<128x128xbf16, #tpu.memory_space<vmem>>, vector<128x128xbf16>
    %cst_5 = arith.constant dense<0.000000e+00> : vector<128x128xf32>
    %5 = tpu.matmul %3, %4, %cst_5 {dimension_numbers = #tpu.dot_dimension_numbers<[1], [0], [0], [1], [0, 0, 1, 1], [], []>} : vector<128x128xbf16>, vector<128x128xbf16>, vector<128x128xf32> -> vector<128x128xf32>
    %c0_6 = arith.constant 0 : index
    %c0_7 = arith.constant 0 : index
    %6 = vector.load %arg3[%c0_6, %c0_7] : memref<1x128xf32, #tpu.memory_space<vmem>>, vector<1x128xf32>
    %7 = vector.broadcast %6 : vector<1x128xf32> to vector<128x128xf32>
    %8 = arith.addf %5, %7 : vector<128x128xf32>
    %cst_8 = arith.constant 0.000000e+00 : f32
    %9 = vector.broadcast %cst_8 : f32 to vector<128x128xf32>
    %10 = arith.maximumf %8, %9 : vector<128x128xf32>
    %11 = arith.truncf %10 : vector<128x128xf32> to vector<128x128xbf16>
    %c0_9 = arith.constant 0 : index
    %c0_10 = arith.constant 0 : index
    %12 = vector.load %arg0[%c0_9, %c0_10] : memref<128x128xbf16, #tpu.memory_space<vmem>>, vector<128x128xbf16>
    %cst_11 = arith.constant dense<0.000000e+00> : vector<128x128xf32>
    %13 = tpu.matmul %12, %11, %cst_11 {dimension_numbers = #tpu.dot_dimension_numbers<[1], [0], [0], [1], [0, 0, 1, 1], [], []>} : vector<128x128xbf16>, vector<128x128xbf16>, vector<128x128xf32> -> vector<128x128xf32>
    %14 = arith.truncf %13 : vector<128x128xf32> to vector<128x128xbf16>
    %c0_12 = arith.constant 0 : index
    %c0_13 = arith.constant 0 : index
    %15 = vector.load %arg4[%c0_12, %c0_13] : memref<128x128xbf16, #tpu.memory_space<vmem>>, vector<128x128xbf16>
    %cst_14 = arith.constant dense<0.000000e+00> : vector<128x128xf32>
    %16 = tpu.matmul %14, %15, %cst_14 {dimension_numbers = #tpu.dot_dimension_numbers<[1], [0], [0], [1], [0, 0, 1, 1], [], []>} : vector<128x128xbf16>, vector<128x128xbf16>, vector<128x128xf32> -> vector<128x128xf32>
    %c0_15 = arith.constant 0 : index
    %c0_16 = arith.constant 0 : index
    %17 = vector.load %arg5[%c0_15, %c0_16] : memref<1x128xf32, #tpu.memory_space<vmem>>, vector<1x128xf32>
    %18 = vector.broadcast %17 : vector<1x128xf32> to vector<128x128xf32>
    %19 = arith.addf %16, %18 : vector<128x128xf32>
    %c0_17 = arith.constant 0 : index
    %c0_18 = arith.constant 0 : index
    %20 = vector.load %arg6[%c0_17, %c0_18] : memref<128x128xf32, #tpu.memory_space<vmem>>, vector<128x128xf32>
    tpu.vector_store %arg6[%c0_17, %c0_18], %19 {strides = array<i32>} : memref<128x128xf32, #tpu.memory_space<vmem>>, vector<128x128xf32>,
    return
  }
}

</mosaic_0001>

<bundles_post_ra>
// kernel: tpu_custom_call.1
= control target key start
LH: loop header
LB: loop body
LE: loop exit
PB: predicated region body
PF: predicated region fallthrough
CT: control target
= control target key end

     0   :  { %11 = vsyncpa [#allocation3], 0  ;;  %s1362_s0 = inlined_call_operand.hbm [shape: bf16[128,128], index: 0, kind: input, shape index: {}]   ;;  %s1363_s1 = inlined_call_operand.hbm [shape: bf16[128,128], index: 1, kind: input, shape index: {}]   ;;  %s1364_s2 = inlined_call_operand.hbm [shape: bf16[128,128], index: 2, kind: input, shape index: {}]   ;;  %s1365_s3 = inlined_call_operand.vmem [shape: f32[1,128], index: 3, kind: input, shape index: {}]   ;;  %s1366_s4 = inlined_call_operand.hbm [shape: bf16[128,128], index: 4, kind: input, shape index: {}]   ;;  %s1367_s5 = inlined_call_operand.vmem [shape: f32[1,128], index: 5, kind: input, shape index: {}]   ;;  %s1368_s6 = inlined_call_operand.hbm [shape: f32[128,128], index: 6, kind: output, shape index: {}]  }
   0x1   :  { %12 = vsyncpa [#allocation6], 0 }
   0x2   :  { %13 = vsyncpa [#allocation9], 0 }
   0x3   :  { %14 = vsyncpa [#allocation4], 0  ;;  %s1198_s21 = smov [#allocation5]   ;;  %s1199_s23 = smov [#allocation2]  }
   0x4   :  { %s32_s22 = sshll.u32 %s1198_s21, 4  ;;  %s20_s24 = sshll.u32 %s1199_s23, 4  ;;  %s33_s22 = int_to_ptr.vmem [resolvable:$true] %s32_s22  ;;  %s1242_s24 = int_to_ptr.vmem [resolvable:$true] %s20_s24 }
   0x5   :  { %s1080_s27 = scalar_lea.hbm %s1363_s1, 1024 }
   0x6   :  { %p1081_p0 = scmp.ne.s32.totalorder %s1363_s1, %s1080_s27  ;;  %p1084_p1 = scmp.lt.u32.totalorder %s1080_s27, %s1363_s1 }
   0x8   :  { %p1086_p2 = pnand %p1084_p1, %p1081_p0 }
   0xa   :  { %1089 = shalt.err (!%p1086_p2)
}
   0xb   :  { %s1090_s8 = scalar_lea.vmem %s33_s22, 1024  ;;  %p1095_p4 = scmp.lt.s32.totalorder %s33_s22, %s33_s22 }
   0xc   :  { %p1091_p3 = scmp.ne.s32.totalorder %s33_s22, %s1090_s8  ;;  %p1096_p5 = scmp.lt.s32.totalorder %s1090_s8, %s1090_s8 }
   0xe   :  { %p1097_p6 = por %p1096_p5, %p1095_p4 }
  0x10   :  { %p1098_p7 = pnand %p1097_p6, %p1091_p3 }
  0x12   :  { %1101 = shalt.err (!%p1098_p7)
}
  0x13   :  { %s1200_s9 = smov 64   ;;  %s1201_s10 = smov 4  }
  0x14   :  { %38 = dma.hbm_to_vmem [thread:$0]  %s1363_s1, 1024, %s33_s22, [#allocation6], %s1200_s9, %s1200_s9, %s1201_s10  }
  0x15   :  { %s1102_s15 = scalar_lea.hbm %s1362_s0, 1024 }
  0x16   :  { %p1103_p8 = scmp.ne.s32.totalorder %s1362_s0, %s1102_s15  ;;  %p1106_p9 = scmp.lt.u32.totalorder %s1102_s15, %s1362_s0 }
  0x18   :  { %p1108_p10 = pnand %p1106_p9, %p1103_p8 }
  0x1a   :  { %1111 = shalt.err (!%p1108_p10)
}
  0x1b   :  { %s1112_s20 = scalar_lea.vmem %s1242_s24, 1024  ;;  %p1117_p12 = scmp.lt.s32.totalorder %s1242_s24, %s1242_s24 }
  0x1c   :  { %p1113_p11 = scmp.ne.s32.totalorder %s1242_s24, %s1112_s20  ;;  %p1118_p13 = scmp.lt.s32.totalorder %s1112_s20, %s1112_s20 }
  0x1e   :  { %p1119_p0 = por %p1118_p13, %p1117_p12 }
  0x20   :  { %p1120_p1 = pnand %p1119_p0, %p1113_p11 }
  0x22   :  { %1123 = shalt.err (!%p1120_p1)
}
  0x23   :  { %26 = dma.hbm_to_vmem [thread:$0]  %s1362_s0, 1024, %s1242_s24, [#allocation3], %s1200_s9, %s1200_s9, %s1201_s10  }
  0x24   :  { %s1202_s22 = smov [#allocation7]   ;;  %s1203_s25 = smov [#allocation8]  }
  0x25   :  { %s44_s23 = sshll.u32 %s1202_s22, 4  ;;  %s58_s26 = sshll.u32 %s1203_s25, 4  ;;  %s45_s23 = int_to_ptr.vmem [resolvable:$true] %s44_s23  ;;  %s1279_s26 = int_to_ptr.vmem [resolvable:$true] %s58_s26 }
  0x26   :  { %s1124_s29 = scalar_lea.hbm %s1364_s2, 1024 }
  0x27   :  { %p1125_p2 = scmp.ne.s32.totalorder %s1364_s2, %s1124_s29  ;;  %p1128_p3 = scmp.lt.u32.totalorder %s1124_s29, %s1364_s2 }
  0x29   :  { %p1130_p4 = pnand %p1128_p3, %p1125_p2 }
  0x2b   :  { %1133 = shalt.err (!%p1130_p4)
}
  0x2c   :  { %s1134_s0 = scalar_lea.vmem %s45_s23, 1024  ;;  %p1139_p6 = scmp.lt.s32.totalorder %s45_s23, %s45_s23 }
  0x2d   :  { %p1135_p5 = scmp.ne.s32.totalorder %s45_s23, %s1134_s0  ;;  %p1140_p7 = scmp.lt.s32.totalorder %s1134_s0, %s1134_s0 }
  0x2f   :  { %p1141_p8 = por %p1140_p7, %p1139_p6 }
  0x31   :  { %p1142_p9 = pnand %p1141_p8, %p1135_p5 }
  0x33   :  { %1145 = shalt.err (!%p1142_p9)
}
  0x34   :  { %50 = dma.hbm_to_vmem [thread:$0]  %s1364_s2, 1024, %s45_s23, [#allocation6], %s1200_s9, %s1200_s9, %s1201_s10  }
  0x35   :  { %s1146_s15 = scalar_lea.hbm %s1366_s4, 1024 }
  0x36   :  { %p1147_p10 = scmp.ne.s32.totalorder %s1366_s4, %s1146_s15  ;;  %p1150_p11 = scmp.lt.u32.totalorder %s1146_s15, %s1366_s4 }
  0x38   :  { %p1152_p12 = pnand %p1150_p11, %p1147_p10 }
  0x3a   :  { %1155 = shalt.err (!%p1152_p12)
}
  0x3b   :  { %s1156_s20 = scalar_lea.vmem %s1279_s26, 1024  ;;  %p1161_p0 = scmp.lt.s32.totalorder %s1279_s26, %s1279_s26 }
  0x3c   :  { %p1157_p13 = scmp.ne.s32.totalorder %s1279_s26, %s1156_s20  ;;  %p1162_p1 = scmp.lt.s32.totalorder %s1156_s20, %s1156_s20 }
  0x3e   :  { %p1163_p2 = por %p1162_p1, %p1161_p0 }
  0x40   :  { %p1164_p3 = pnand %p1163_p2, %p1157_p13 }
  0x42   :  { %1167 = shalt.err (!%p1164_p3)
}
  0x43   :  { %64 = dma.hbm_to_vmem [thread:$0]  %s1366_s4, 1024, %s1279_s26, [#allocation9], %s1200_s9, %s1200_s9, %s1201_s10  }
  0x44   :  { %1190 = dma.done.wait [#allocation3], 1024  }
  0x45   :  { %1191 = vsyncadd [#allocation3], 4294966272 }
  0x46   :  { %1192 = dma.done.wait [#allocation6], 2048  }
  0x47   :  { %1193 = vsyncadd [#allocation6], 4294965248 }
  0x48   :  { %1194 = dma.done.wait [#allocation9], 1024  }
  0x49   :  { %1195 = vsyncadd [#allocation9], 4294966272  ;;  %v1048_v0 = vld [vmem:[#allocation5] sm:$0xff]   ;;  %v1049_v1 = vld [vmem:[#allocation5 + $0x8] sm:$0xff]  }
  0x4a   :  { %911 = vmatprep.subr.bf16.mxu0 %v1048_v0  ;;  %v1050_v2 = vld [vmem:[#allocation5 + $0x10] sm:$0xff]   ;;  %v1051_v3 = vld [vmem:[#allocation5 + $0x18] sm:$0xff]   ;;  %v1056_v4 = vld [vmem:[#allocation2] sm:$0xff]  }
  0x4b   :  { %912 = vmatpush3.bf16.msra.mxu0 %v1048_v0  ;;  %927 = vmatprep.mubr.bf16.mxu0 %v1056_v4  ;;  %v1052_v5 = vld [vmem:[#allocation5 + $0x20] sm:$0xff]   ;;  %v1053_v6 = vld [vmem:[#allocation5 + $0x28] sm:$0xff]   ;;  %v1054_v9 = vld [vmem:[#allocation5 + $0x30] sm:$0xff]  }
  0x4c   :  { %913 = vmatprep.subr.bf16.mxu0 %v1049_v1  ;;  %v1064_v7 = vld [vmem:[#allocation7] sm:$0xff]   ;;  %v1065_v8 = vld [vmem:[#allocation7 + $0x8] sm:$0xff]   ;;  %v1066_v10 = vld [vmem:[#allocation7 + $0x10] sm:$0xff]  }
  0x4d   :  { %943 = vmatprep.subr.bf16.mxu1 %v1064_v7  ;;  %v1055_v11 = vld [vmem:[#allocation5 + $0x38] sm:$0xff]   ;;  %v1068_v13 = vld [vmem:[#allocation7 + $0x20] sm:$0xff]   ;;  %v1316_v14 = vld [vmem:[#allocation2 + $0x8] sm:$0xff]  }
  0x4e   :  { %944 = vmatpush3.bf16.msra.mxu1 %v1064_v7  ;;  %v1067_v12 = vld [vmem:[#allocation7 + $0x18] sm:$0xff]   ;;  %v1318_v15 = vld [vmem:[#allocation2 + $0x10] sm:$0xff]   ;;  %v1069_v16 = vld [vmem:[#allocation7 + $0x28] sm:$0xff]  }
  0x4f   :  { %914 = vmatpush3.bf16.msra.mxu0 %v1049_v1  ;;  %945 = vmatprep.subr.bf16.mxu1 %v1065_v8  ;;  %v1070_v17 = vld [vmem:[#allocation7 + $0x30] sm:$0xff]   ;;  %v1322_v18 = vld [vmem:[#allocation2 + $0x18] sm:$0xff]   ;;  %v1324_v19 = vld [vmem:[#allocation2 + $0x20] sm:$0xff]  }
  0x50   :  { %915 = vmatprep.subr.bf16.mxu0 %v1050_v2  ;;  %v1328_v20 = vld [vmem:[#allocation2 + $0x28] sm:$0xff]   ;;  %v1330_v21 = vld [vmem:[#allocation2 + $0x30] sm:$0xff]   ;;  %v1334_v22 = vld [vmem:[#allocation2 + $0x38] sm:$0xff]  }
  0x51   :  { %v1071_v23 = vld [vmem:[#allocation7 + $0x38] sm:$0xff]   ;;  %v1072_v48 = vld [vmem:[#allocation8] sm:$0xff]   ;;  %v1073_v49 = vld [vmem:[#allocation8 + $0x8] sm:$0xff]  }
  0x52   :  { %946 = vmatpush3.bf16.msra.mxu1 %v1065_v8  ;;  %v1074_v50 = vld [vmem:[#allocation8 + $0x10] sm:$0xff]   ;;  %v1075_v51 = vld [vmem:[#allocation8 + $0x18] sm:$0xff]   ;;  %v1076_v52 = vld [vmem:[#allocation8 + $0x20] sm:$0xff]  }
  0x53   :  { %916 = vmatpush3.bf16.msra.mxu0 %v1050_v2  ;;  %947 = vmatprep.subr.bf16.mxu1 %v1066_v10  ;;  %v1077_v53 = vld [vmem:[#allocation8 + $0x28] sm:$0xff]   ;;  %v1078_v54 = vld [vmem:[#allocation8 + $0x30] sm:$0xff]   ;;  %v829_v55 = vld [vmem:[%s1365_s3] ss:$0 sm:$0xff] }
  0x54   :  { %917 = vmatprep.subr.bf16.mxu0 %v1051_v3 }
  0x56   :  { %948 = vmatpush3.bf16.msra.mxu1 %v1066_v10 }
  0x57   :  { %918 = vmatpush3.bf16.msra.mxu0 %v1051_v3  ;;  %949 = vmatprep.subr.bf16.mxu1 %v1067_v12 }
  0x58   :  { %919 = vmatprep.subr.bf16.mxu0 %v1052_v5 }
  0x5a   :  { %950 = vmatpush3.bf16.msra.mxu1 %v1067_v12 }
  0x5b   :  { %920 = vmatpush3.bf16.msra.mxu0 %v1052_v5  ;;  %951 = vmatprep.subr.bf16.mxu1 %v1068_v13 }
  0x5c   :  { %921 = vmatprep.subr.bf16.mxu0 %v1053_v6 }
  0x5e   :  { %952 = vmatpush3.bf16.msra.mxu1 %v1068_v13 }
  0x5f   :  { %922 = vmatpush3.bf16.msra.mxu0 %v1053_v6  ;;  %953 = vmatprep.subr.bf16.mxu1 %v1069_v16 }
  0x60   :  { %923 = vmatprep.subr.bf16.mxu0 %v1054_v9 }
  0x62   :  { %954 = vmatpush3.bf16.msra.mxu1 %v1069_v16 }
  0x63   :  { %924 = vmatpush3.bf16.msra.mxu0 %v1054_v9  ;;  %955 = vmatprep.subr.bf16.mxu1 %v1070_v17 }
  0x64   :  { %925 = vmatprep.subr.bf16.mxu0 %v1055_v11 }
  0x66   :  { %956 = vmatpush3.bf16.msra.mxu1 %v1070_v17 }
  0x67   :  { %926 = vmatpush3.bf16.msra.mxu0 %v1055_v11  ;;  %957 = vmatprep.subr.bf16.mxu1 %v1071_v23 }
  0x6a   :  { %928 = vmatmul.mubr.bf16.vlgmr.msra.gmra.mrb[0].mxu0 %v1316_v14  ;;  %958 = vmatpush3.bf16.msra.mxu1 %v1071_v23 }
  0x6b   :  { %931 = vmatprep.mubr.bf16.mxu0 %v1318_v15  ;;  %1007 = vmatprep.subr.bf16.mxu1 %v1072_v48 }
  0x72   :  { %932 = vmatmul.mubr.bf16.gmra.mrb[4].mxu0 %v1322_v18 }
  0x73   :  { %935 = vmatprep.mubr.bf16.mxu0 %v1324_v19 }
  0x7a   :  { %936 = vmatmul.mubr.bf16.gmra.mrb[8].mxu0 %v1328_v20 }
  0x7b   :  { %939 = vmatprep.mubr.bf16.mxu0 %v1330_v21 }
  0x82   :  { %940 = vmatmul.mubr.bf16.gmra.mrb[12].mxu0 %v1334_v22 }
  0x83   :  { %991 = vmatprep.mubr.bf16.mxu0 %v1056_v4 }
 0x13d   :  { %v929_v24 = vpop.f32.mrb[0].mxu0 }
 0x13e   :  { %v242_v25 = vpop.f32.mrb[1].mxu0 }
 0x13f   :  { %v930_v26 = vpop.f32.mrb[2].mxu0 }
 0x140   :  { %v306_v27 = vpack.c.bf16 %v930_v26, %v929_v24  ;;  %v245_v28 = vpop.f32.mrb[3].mxu0 }
 0x141   :  { %v305_v29 = vpack.c.bf16 %v245_v28, %v242_v25 }
 0x143   :  { %959 = vmatprep.mubr.bf16.mxu1 %v305_v29 }
 0x144   :  { %960 = vmatmul.mubr.bf16.vlgmr.msra.gmra.mrb[0].mxu1 %v306_v27 }
 0x145   :  { %v933_v30 = vpop.f32.mrb[4].mxu0  ;;  %1008 = vmatpush3.bf16.msra.mxu1 %v1072_v48 }
 0x146   :  { %v258_v31 = vpop.f32.mrb[5].mxu0  ;;  %1009 = vmatprep.subr.bf16.mxu1 %v1073_v49 }
 0x147   :  { %v934_v32 = vpop.f32.mrb[6].mxu0 }
 0x148   :  { %v308_v33 = vpack.c.bf16 %v934_v32, %v933_v30  ;;  %v261_v34 = vpop.f32.mrb[7].mxu0 }
 0x149   :  { %v307_v35 = vpack.c.bf16 %v261_v34, %v258_v31  ;;  %1010 = vmatpush3.bf16.msra.mxu1 %v1073_v49 }
 0x14a   :  { %1011 = vmatprep.subr.bf16.mxu1 %v1074_v50 }
 0x14b   :  { %963 = vmatprep.mubr.bf16.mxu1 %v307_v35 }
 0x14c   :  { %964 = vmatmul.mubr.bf16.gmra.mrb[4].mxu1 %v308_v33 }
 0x14d   :  { %v937_v36 = vpop.f32.mrb[8].mxu0  ;;  %1012 = vmatpush3.bf16.msra.mxu1 %v1074_v50 }
 0x14e   :  { %v274_v37 = vpop.f32.mrb[9].mxu0  ;;  %1013 = vmatprep.subr.bf16.mxu1 %v1075_v51 }
 0x14f   :  { %v938_v38 = vpop.f32.mrb[10].mxu0 }
 0x150   :  { %v310_v39 = vpack.c.bf16 %v938_v38, %v937_v36  ;;  %v277_v40 = vpop.f32.mrb[11].mxu0 }
 0x151   :  { %v309_v41 = vpack.c.bf16 %v277_v40, %v274_v37  ;;  %1014 = vmatpush3.bf16.msra.mxu1 %v1075_v51 }
 0x152   :  { %1015 = vmatprep.subr.bf16.mxu1 %v1076_v52 }
 0x153   :  { %967 = vmatprep.mubr.bf16.mxu1 %v309_v41 }
 0x154   :  { %968 = vmatmul.mubr.bf16.gmra.mrb[8].mxu1 %v310_v39 }
 0x155   :  { %v941_v42 = vpop.f32.mrb[12].mxu0  ;;  %1016 = vmatpush3.bf16.msra.mxu1 %v1076_v52 }
 0x156   :  { %v290_v43 = vpop.f32.mrb[13].mxu0  ;;  %1017 = vmatprep.subr.bf16.mxu1 %v1077_v53 }
 0x157   :  { %v942_v44 = vpop.f32.mrb[14].mxu0 }
 0x158   :  { %v312_v45 = vpack.c.bf16 %v942_v44, %v941_v42  ;;  %v293_v46 = vpop.f32.mrb[15].mxu0 }
 0x159   :  { %v311_v47 = vpack.c.bf16 %v293_v46, %v290_v43  ;;  %1018 = vmatpush3.bf16.msra.mxu1 %v1077_v53 }
 0x15a   :  { %1019 = vmatprep.subr.bf16.mxu1 %v1078_v54 }
 0x15b   :  { %971 = vmatprep.mubr.bf16.mxu1 %v311_v47 }
 0x15c   :  { %972 = vmatmul.mubr.bf16.gmra.mrb[12].mxu1 %v312_v45 }
 0x15d   :  { %1020 = vmatpush3.bf16.msra.mxu1 %v1078_v54 }
 0x217   :  { %v961_v56 = vpop.f32.mrb[0].mxu1 }
 0x218   :  { %v427_v57 = vadd.f32 %v961_v56, %v829_v55  ;;  %v418_v58 = vpop.f32.mrb[1].mxu1 }
 0x219   :  { %v419_v59 = vadd.f32 %v829_v55, %v418_v58  ;;  %v962_v60 = vpop.f32.mrb[2].mxu1 }
 0x21a   :  { %v430_v61 = vadd.f32 %v962_v60, %v829_v55  ;;  %v421_v62 = vpop.f32.mrb[3].mxu1  ;;  %v483_v0 = vmax.f32 %v427_v57, 0.0 }
 0x21b   :  { %v422_v63 = vadd.f32 %v829_v55, %v421_v62  ;;  %v481_v2 = vmax.f32 %v419_v59, 0.0 }
 0x21c   :  { %v484_v1 = vmax.f32 %v430_v61, 0.0 }
 0x21d   :  { %v482_v3 = vmax.f32 %v422_v63, 0.0 }
 0x21e   :  { %v498_v4 = vpack.c.bf16 %v484_v1, %v483_v0 }
 0x21f   :  { %v497_v5 = vpack.c.bf16 %v482_v3, %v481_v2  ;;  %v965_v6 = vpop.f32.mrb[4].mxu1 }
 0x220   :  { %v443_v7 = vadd.f32 %v965_v6, %v829_v55  ;;  %v434_v8 = vpop.f32.mrb[5].mxu1 }
 0x221   :  { %v435_v9 = vadd.f32 %v829_v55, %v434_v8  ;;  %v966_v10 = vpop.f32.mrb[6].mxu1  ;;  %975 = vmatprep.subr.bf16.mxu0 %v497_v5 }
 0x222   :  { %v446_v11 = vadd.f32 %v966_v10, %v829_v55  ;;  %v437_v12 = vpop.f32.mrb[7].mxu1  ;;  %976 = vmatpush3.bf16.msra.mxu0 %v497_v5  ;;  %v487_v16 = vmax.f32 %v443_v7, 0.0 }
 0x223   :  { %v438_v13 = vadd.f32 %v829_v55, %v437_v12  ;;  %977 = vmatprep.subr.bf16.mxu0 %v498_v4  ;;  %v485_v23 = vmax.f32 %v435_v9, 0.0  ;;  %v838_v9 = vld [vmem:[%s1367_s5] ss:$0 sm:$0xff]  ;;  %s1204_s5 = smov [#allocation10]  }
 0x224   :  { %v488_v17 = vmax.f32 %v446_v11, 0.0  ;;  %s799_s21 = sshll.u32 %s1204_s5, 4  ;;  %s800_s21 = int_to_ptr.vmem [resolvable:$true] %s799_s21 }
 0x225   :  { %v486_v24 = vmax.f32 %v438_v13, 0.0  ;;  %s1168_s22 = scalar_lea.vmem %s800_s21, 2048  ;;  %p1173_p5 = scmp.lt.s32.totalorder %s800_s21, %s800_s21 }
 0x226   :  { %v500_v25 = vpack.c.bf16 %v488_v17, %v487_v16  ;;  %978 = vmatpush3.bf16.msra.mxu0 %v498_v4  ;;  %p1169_p4 = scmp.ne.s32.totalorder %s800_s21, %s1168_s22  ;;  %p1174_p6 = scmp.lt.s32.totalorder %s1168_s22, %s1168_s22 }
 0x227   :  { %v499_v26 = vpack.c.bf16 %v486_v24, %v485_v23  ;;  %v969_v27 = vpop.f32.mrb[8].mxu1 }
 0x228   :  { %v459_v28 = vadd.f32 %v969_v27, %v829_v55  ;;  %v450_v29 = vpop.f32.mrb[9].mxu1  ;;  %p1175_p7 = por %p1174_p6, %p1173_p5 }
 0x229   :  { %v451_v30 = vadd.f32 %v829_v55, %v450_v29  ;;  %v970_v31 = vpop.f32.mrb[10].mxu1  ;;  %979 = vmatprep.subr.bf16.mxu0 %v499_v26 }
 0x22a   :  { %v462_v32 = vadd.f32 %v970_v31, %v829_v55  ;;  %v453_v33 = vpop.f32.mrb[11].mxu1  ;;  %980 = vmatpush3.bf16.msra.mxu0 %v499_v26  ;;  %v491_v35 = vmax.f32 %v459_v28, 0.0  ;;  %p1176_p8 = pnand %p1175_p7, %p1169_p4 }
 0x22b   :  { %v454_v34 = vadd.f32 %v829_v55, %v453_v33  ;;  %981 = vmatprep.subr.bf16.mxu0 %v500_v25  ;;  %v489_v37 = vmax.f32 %v451_v30, 0.0 }
 0x22c   :  { %v492_v36 = vmax.f32 %v462_v32, 0.0 }
 0x22d   :  { %v490_v38 = vmax.f32 %v454_v34, 0.0 }
 0x22e   :  { %v502_v39 = vpack.c.bf16 %v492_v36, %v491_v35  ;;  %982 = vmatpush3.bf16.msra.mxu0 %v500_v25 }
 0x22f   :  { %v501_v40 = vpack.c.bf16 %v490_v38, %v489_v37  ;;  %v973_v41 = vpop.f32.mrb[12].mxu1 }
 0x230   :  { %v475_v42 = vadd.f32 %v973_v41, %v829_v55  ;;  %v466_v43 = vpop.f32.mrb[13].mxu1 }
 0x231   :  { %v467_v44 = vadd.f32 %v829_v55, %v466_v43  ;;  %v974_v45 = vpop.f32.mrb[14].mxu1  ;;  %983 = vmatprep.subr.bf16.mxu0 %v501_v40 }
 0x232   :  { %v478_v46 = vadd.f32 %v974_v45, %v829_v55  ;;  %v469_v47 = vpop.f32.mrb[15].mxu1  ;;  %984 = vmatpush3.bf16.msra.mxu0 %v501_v40  ;;  %v495_v49 = vmax.f32 %v475_v42, 0.0 }
 0x233   :  { %v470_v48 = vadd.f32 %v829_v55, %v469_v47  ;;  %985 = vmatprep.subr.bf16.mxu0 %v502_v39  ;;  %v493_v51 = vmax.f32 %v467_v44, 0.0  ;;  %v1079_v55 = vld [vmem:[#allocation8 + $0x38] sm:$0xff]  }
 0x234   :  { %v496_v50 = vmax.f32 %v478_v46, 0.0  ;;  %1021 = vmatprep.subr.bf16.mxu1 %v1079_v55 }
 0x235   :  { %v494_v52 = vmax.f32 %v470_v48, 0.0  ;;  %1022 = vmatpush3.bf16.msra.mxu1 %v1079_v55 }
 0x236   :  { %v504_v53 = vpack.c.bf16 %v496_v50, %v495_v49  ;;  %986 = vmatpush3.bf16.msra.mxu0 %v502_v39 }
 0x237   :  { %v503_v54 = vpack.c.bf16 %v494_v52, %v493_v51 }
 0x239   :  { %987 = vmatprep.subr.bf16.mxu0 %v503_v54 }
 0x23a   :  { %988 = vmatpush3.bf16.msra.mxu0 %v503_v54 }
 0x23b   :  { %989 = vmatprep.subr.bf16.mxu0 %v504_v53 }
 0x23e   :  { %990 = vmatpush3.bf16.msra.mxu0 %v504_v53 }
 0x241   :  { %992 = vmatmul.mubr.bf16.vlgmr.msra.gmra.mrb[16].mxu0 %v1316_v14 }
 0x242   :  { %995 = vmatprep.mubr.bf16.mxu0 %v1318_v15 }
 0x249   :  { %996 = vmatmul.mubr.bf16.gmra.mrb[20].mxu0 %v1322_v18 }
 0x24a   :  { %999 = vmatprep.mubr.bf16.mxu0 %v1324_v19 }
 0x251   :  { %1000 = vmatmul.mubr.bf16.gmra.mrb[24].mxu0 %v1328_v20 }
 0x252   :  { %1003 = vmatprep.mubr.bf16.mxu0 %v1330_v21 }
 0x259   :  { %1004 = vmatmul.mubr.bf16.gmra.mrb[28].mxu0 %v1334_v22 }
 0x314   :  { %v993_v56 = vpop.f32.mrb[16].mxu0 }
 0x315   :  { %v539_v57 = vpop.f32.mrb[17].mxu0 }
 0x316   :  { %v994_v58 = vpop.f32.mrb[18].mxu0 }
 0x317   :  { %v603_v59 = vpack.c.bf16 %v994_v58, %v993_v56  ;;  %v542_v14 = vpop.f32.mrb[19].mxu0 }
 0x318   :  { %v602_v60 = vpack.c.bf16 %v542_v14, %v539_v57 }
 0x31a   :  { %1023 = vmatprep.mubr.bf16.mxu1 %v602_v60 }
 0x31b   :  { %1024 = vmatmul.mubr.bf16.vlgmr.msra.gmra.mrb[16].mxu1 %v603_v59 }
 0x31c   :  { %v997_v15 = vpop.f32.mrb[20].mxu0 }
 0x31d   :  { %v555_v18 = vpop.f32.mrb[21].mxu0 }
 0x31e   :  { %v998_v19 = vpop.f32.mrb[22].mxu0 }
 0x31f   :  { %v605_v61 = vpack.c.bf16 %v998_v19, %v997_v15  ;;  %v558_v20 = vpop.f32.mrb[23].mxu0 }
 0x320   :  { %v604_v62 = vpack.c.bf16 %v558_v20, %v555_v18 }
 0x322   :  { %1027 = vmatprep.mubr.bf16.mxu1 %v604_v62 }
 0x323   :  { %1028 = vmatmul.mubr.bf16.gmra.mrb[20].mxu1 %v605_v61 }
 0x324   :  { %v1001_v21 = vpop.f32.mrb[24].mxu0 }
 0x325   :  { %v571_v22 = vpop.f32.mrb[25].mxu0 }
 0x326   :  { %v1002_v63 = vpop.f32.mrb[26].mxu0 }
 0x327   :  { %v607_v0 = vpack.c.bf16 %v1002_v63, %v1001_v21  ;;  %v574_v1 = vpop.f32.mrb[27].mxu0 }
 0x328   :  { %v606_v2 = vpack.c.bf16 %v574_v1, %v571_v22 }
 0x32a   :  { %1031 = vmatprep.mubr.bf16.mxu1 %v606_v2 }
 0x32b   :  { %1032 = vmatmul.mubr.bf16.gmra.mrb[24].mxu1 %v607_v0 }
 0x32c   :  { %v1005_v3 = vpop.f32.mrb[28].mxu0 }
 0x32d   :  { %v587_v4 = vpop.f32.mrb[29].mxu0 }
 0x32e   :  { %v1006_v5 = vpop.f32.mrb[30].mxu0 }
 0x32f   :  { %v609_v6 = vpack.c.bf16 %v1006_v5, %v1005_v3  ;;  %v590_v7 = vpop.f32.mrb[31].mxu0 }
 0x330   :  { %v608_v8 = vpack.c.bf16 %v590_v7, %v587_v4 }
 0x332   :  { %1035 = vmatprep.mubr.bf16.mxu1 %v608_v8 }
 0x333   :  { %1036 = vmatmul.mubr.bf16.gmra.mrb[28].mxu1 %v609_v6 }
 0x3ee   :  { %v1025_v10 = vpop.f32.mrb[16].mxu1 }
 0x3ef   :  { %v724_v11 = vadd.f32 %v1025_v10, %v838_v9  ;;  %v715_v12 = vpop.f32.mrb[17].mxu1 }
 0x3f0   :  { %v716_v13 = vadd.f32 %v838_v9, %v715_v12  ;;  %v1026_v16 = vpop.f32.mrb[18].mxu1 }
 0x3f1   :  { %780 = vst [vmem:[#allocation10 + $0x10] sm:$0xff] %v724_v11  ;;  %v727_v17 = vadd.f32 %v1026_v16, %v838_v9  ;;  %v718_v23 = vpop.f32.mrb[19].mxu1 }
 0x3f2   :  { %778 = vst [vmem:[#allocation10] sm:$0xff] %v716_v13  ;;  %v719_v24 = vadd.f32 %v838_v9, %v718_v23 }
 0x3f3   :  { %781 = vst [vmem:[#allocation10 + $0x18] sm:$0xff] %v727_v17 }
 0x3f4   :  { %779 = vst [vmem:[#allocation10 + $0x8] sm:$0xff] %v719_v24 }
 0x3f6   :  { %v1029_v25 = vpop.f32.mrb[20].mxu1 }
 0x3f7   :  { %v740_v26 = vadd.f32 %v1029_v25, %v838_v9  ;;  %v731_v27 = vpop.f32.mrb[21].mxu1 }
 0x3f8   :  { %v732_v28 = vadd.f32 %v838_v9, %v731_v27  ;;  %v1030_v29 = vpop.f32.mrb[22].mxu1 }
 0x3f9   :  { %784 = vst [vmem:[#allocation10 + $0x30] sm:$0xff] %v740_v26  ;;  %v743_v30 = vadd.f32 %v1030_v29, %v838_v9  ;;  %v734_v31 = vpop.f32.mrb[23].mxu1 }
 0x3fa   :  { %782 = vst [vmem:[#allocation10 + $0x20] sm:$0xff] %v732_v28  ;;  %v735_v32 = vadd.f32 %v838_v9, %v734_v31 }
 0x3fb   :  { %785 = vst [vmem:[#allocation10 + $0x38] sm:$0xff] %v743_v30 }
 0x3fc   :  { %783 = vst [vmem:[#allocation10 + $0x28] sm:$0xff] %v735_v32 }
 0x3fe   :  { %v1033_v33 = vpop.f32.mrb[24].mxu1 }
 0x3ff   :  { %v756_v34 = vadd.f32 %v1033_v33, %v838_v9  ;;  %v747_v35 = vpop.f32.mrb[25].mxu1 }
 0x400   :  { %v748_v36 = vadd.f32 %v838_v9, %v747_v35  ;;  %v1034_v37 = vpop.f32.mrb[26].mxu1 }
 0x401   :  { %788 = vst [vmem:[#allocation10 + $0x50] sm:$0xff] %v756_v34  ;;  %v759_v38 = vadd.f32 %v1034_v37, %v838_v9  ;;  %v750_v39 = vpop.f32.mrb[27].mxu1 }
 0x402   :  { %786 = vst [vmem:[#allocation10 + $0x40] sm:$0xff] %v748_v36  ;;  %v751_v40 = vadd.f32 %v838_v9, %v750_v39 }
 0x403   :  { %789 = vst [vmem:[#allocation10 + $0x58] sm:$0xff] %v759_v38 }
 0x404   :  { %787 = vst [vmem:[#allocation10 + $0x48] sm:$0xff] %v751_v40 }
 0x406   :  { %v1037_v41 = vpop.f32.mrb[28].mxu1 }
 0x407   :  { %v772_v42 = vadd.f32 %v1037_v41, %v838_v9  ;;  %v763_v43 = vpop.f32.mrb[29].mxu1 }
 0x408   :  { %v764_v44 = vadd.f32 %v838_v9, %v763_v43  ;;  %v1038_v45 = vpop.f32.mrb[30].mxu1 }
 0x409   :  { %792 = vst [vmem:[#allocation10 + $0x70] sm:$0xff] %v772_v42  ;;  %v775_v46 = vadd.f32 %v1038_v45, %v838_v9  ;;  %v766_v47 = vpop.f32.mrb[31].mxu1 }
 0x40a   :  { %790 = vst [vmem:[#allocation10 + $0x60] sm:$0xff] %v764_v44  ;;  %v767_v48 = vadd.f32 %v838_v9, %v766_v47 }
 0x40b   :  { %793 = vst [vmem:[#allocation10 + $0x78] sm:$0xff] %v775_v46 }
 0x40c   :  { %791 = vst [vmem:[#allocation10 + $0x68] sm:$0xff] %v767_v48 }
 0x40d   :  { %1179 = shalt.err (!%p1176_p8)
}
 0x40e   :  { %s1180_s26 = scalar_lea.hbm %s1368_s6, 2048 }
 0x40f   :  { %p1181_p9 = scmp.ne.s32.totalorder %s1368_s6, %s1180_s26  ;;  %p1184_p10 = scmp.lt.u32.totalorder %s1180_s26, %s1368_s6 }
 0x411   :  { %p1186_p11 = pnand %p1184_p10, %p1181_p9 }
 0x413   :  { %1189 = shalt.err (!%p1186_p11)
}
 0x414   :  { %s1205_s7 = smov 128   ;;  %s1206_s8 = smov 8  }
 0x415   :  { %805 = dma.vmem_to_hbm [thread:$0]  %s800_s21, 2048, %s1368_s6, [#allocation4], %s1205_s7, %s1205_s7, %s1206_s8  }
 0x416   :  { %1196 = dma.done.wait [#allocation4], 2048  }
 0x417   :  { %1197 = vsyncadd [#allocation4], 4294965248 }
 0x418   :  { %809 = vsyncpa [#allocation3], 1 }
 0x419   :  { %810 = vsyncpa [#allocation6], 1 }
 0x41a   :  { %811 = vsyncpa [#allocation9], 1 }
 0x41b   :  { %812 = vsyncpa [#allocation4], 1 }

</bundles_post_ra>
